<compile_context>
chip_gen: v5e
topology: v5e:2x2
jax: 0.10.0
libtpu: 0.0.40
codegen_flags: <defaults>
</compile_context>

<pallas_src>
import functools

import jax
import jax.numpy as jnp
from jax.experimental import pallas as pl
from jax.experimental.pallas import tpu as pltpu

EPS = 1e-5
LANE = 128
ROW_ALIGN = 16            # sublane alignment valid for both bf16 and f32 blocks
MAX_TB = 1024             # batch-tile cap (measured: 512->85%, 1024->86% of HBM roofline)


def _round_up(n, m):
    return ((n + m - 1) // m) * m


def _pad2d(a, rows, cols):
    return jnp.pad(a, ((0, rows - a.shape[0]), (0, cols - a.shape[1])))


def _chip_config():
    """Per-generation VMEM budget and TensorCore count (conservative fallbacks)."""
    phys_vmem = None
    try:
        phys_vmem = int(pltpu.get_tpu_info().vmem_capacity_bytes)
    except Exception:
        phys_vmem = None
    kind = ""
    try:
        kind = jax.devices()[0].device_kind.lower()
    except Exception:
        pass
    if phys_vmem is None:
        # only assume the big 128 MiB VMEM when we positively identify v5/v6
        phys_vmem = (128 * 1024 * 1024 if ("v5" in kind or "v6" in kind)
                     else 64 * 1024 * 1024)
    n_cores = 2 if "v7" in kind else 1          # v7x: 2 TensorCores per chip
    vmem_limit = min(phys_vmem // 2, 64 * 1024 * 1024)
    return vmem_limit, n_cores


def _pick_batch_tiling(B, D, Hp, Cp, n_cores, budget_bytes):
    """tb/nb/Bp such that double-buffered tiles + resident weights fit the budget."""
    # resident (constant-index) blocks, conservatively counted double-buffered
    weight_bytes = 2 * ((D * Hp + 2 * Hp * Hp + Hp * Cp) * 2
                        + (2 * Hp + Cp) * 4 + 2 * Cp * 4)
    # per batch row: double-buffered bf16 x in, bf16 y out, f32 hidden temps
    per_row = 2 * (2 * D) + 2 * (2 * Cp) + 2 * (4 * Hp)
    cap = (budget_bytes - weight_bytes) // max(per_row, 1)
    cap = max(ROW_ALIGN, (cap // ROW_ALIGN) * ROW_ALIGN)
    tb_cap = min(MAX_TB, cap)

    nb = pl.cdiv(B, tb_cap)
    # keep every TensorCore busy on the batch-parallel axis (v7x megacore)
    if n_cores > 1 and B > 4 * ROW_ALIGN * n_cores and nb % n_cores != 0:
        nb += n_cores - (nb % n_cores)
    tb = _round_up(pl.cdiv(B, nb), ROW_ALIGN)
    return tb, nb, nb * tb


# ---------- Pass 1: fused Linear->ReLU x3 -> Linear + BN partial stats ----------
def mlp_fused_kernel(x_ref, w1_ref, w2_ref, w3_ref, w4_ref, bh_ref, bc_ref,
                     y_ref, part_ref, *, b_real, tb, needs_mask):
    # bf16 MXU operands, f32 accumulation; bias/ReLU math stays f32 on the VPU.
    h = jnp.dot(x_ref[...], w1_ref[...], preferred_element_type=jnp.float32)
    h = jnp.maximum(h, 0.0)

    h = jnp.dot(h.astype(jnp.bfloat16), w2_ref[...],
                preferred_element_type=jnp.float32) + bh_ref[0:1, :]
    h = jnp.maximum(h, 0.0)

    h = jnp.dot(h.astype(jnp.bfloat16), w3_ref[...],
                preferred_element_type=jnp.float32) + bh_ref[1:2, :]
    h = jnp.maximum(h, 0.0)

    y = jnp.dot(h.astype(jnp.bfloat16), w4_ref[...],
                preferred_element_type=jnp.float32) + bc_ref[...]

    # Fused BatchNorm partial statistics (f32, BEFORE the bf16 downcast of y);
    # padded batch rows are masked so full-batch stats match PyTorch exactly.
    if needs_mask:
        rows = (pl.program_id(0) * tb
                + jax.lax.broadcasted_iota(jnp.int32, y.shape, 0))
        ym = jnp.where(rows < b_real, y, 0.0)
    else:
        ym = y
    part_ref[0:1, :] = jnp.sum(ym, axis=0, keepdims=True)        # sum
    part_ref[1:2, :] = jnp.sum(ym * ym, axis=0, keepdims=True)   # sum of squares

    y_ref[...] = y.astype(y_ref.dtype)                            # bf16 writeback


# ---------- Pass 2: BN-apply (precomputed scale/shift) + exact sigmoid ----------
def bn_sigmoid_kernel(y_ref, ss_ref, o_ref):
    z = y_ref[...].astype(jnp.float32) * ss_ref[0:1, :] + ss_ref[1:2, :]
    # exact sigmoid (pass is HBM-bound -> exact divide is free; exp on the EUP)
    o_ref[...] = 1.0 / (1.0 + jnp.exp(-z))


def prepare_params(params):
    """One-time layout plumbing: pad/pack/cast weights (hoisted out of forward)."""
    (w1, w2, b2, w3, b3, w4, b4, gamma, beta) = params
    D, H = w1.shape
    C = w4.shape[1]
    Hp = _round_up(H, LANE)
    Cp = _round_up(C, LANE)
    return dict(
        w1p=_pad2d(w1, D, Hp).astype(jnp.bfloat16),   # D kept unpadded (full-D block)
        w2p=_pad2d(w2, Hp, Hp).astype(jnp.bfloat16),
        w3p=_pad2d(w3, Hp, Hp).astype(jnp.bfloat16),
        w4p=_pad2d(w4, Hp, Cp).astype(jnp.bfloat16),
        bh=jnp.stack([jnp.pad(b2, (0, Hp - H)),
                      jnp.pad(b3, (0, Hp - H))]).astype(jnp.float32),
        bc=jnp.pad(b4, (0, Cp - C)).astype(jnp.float32)[None, :],
        gamma_p=jnp.pad(gamma, (0, Cp - C), constant_values=1.0).astype(jnp.float32),
        beta_p=jnp.pad(beta, (0, Cp - C)).astype(jnp.float32),
    )


def simple_mlp_forward(x, prep, *, out_channels):
    B, D = x.shape
    Hp = prep["w2p"].shape[0]
    Cp = prep["w4p"].shape[1]
    C = out_channels

    vmem_limit, n_cores = _chip_config()
    tb, nb, Bp = _pick_batch_tiling(B, D, Hp, Cp, n_cores, (vmem_limit * 3) // 4)

    # bf16 cast (+ batch pad only when needed); fuses into one op under jit.
    xb = x.astype(jnp.bfloat16)
    if Bp != B:
        xb = jnp.pad(xb, ((0, Bp - B), (0, 0)))

    row = lambda i: (i, 0)       # batch-tiled arrays
    const = lambda i: (0, 0)     # resident weights / packed params

    # ---- pass 1: batch-tiled, batch-parallel fused MLP + BN partial stats ----
    flops1 = 2 * Bp * (D * Hp + 2 * Hp * Hp + Hp * Cp) + 4 * Bp * Cp
    bytes1 = (Bp * D * 2
              + (prep["w1p"].size + prep["w2p"].size + prep["w3p"].size
                 + prep["w4p"].size) * 2
              + (prep["bh"].size + prep["bc"].size) * 4
              + Bp * Cp * 2 + nb * 2 * Cp * 4)
    y_pre, part = pl.pallas_call(
        functools.partial(mlp_fused_kernel, b_real=B, tb=tb, needs_mask=(Bp != B)),
        out_shape=(jax.ShapeDtypeStruct((Bp, Cp), jnp.bfloat16),
                   jax.ShapeDtypeStruct((nb, 2, Cp), jnp.float32)),
        grid=(nb,),
        in_specs=[
            pl.BlockSpec((tb, D), row),      # full-D block: exempt from 128 rule
            pl.BlockSpec((D, Hp), const),
            pl.BlockSpec((Hp, Hp), const),
            pl.BlockSpec((Hp, Hp), const),
            pl.BlockSpec((Hp, Cp), const),
            pl.BlockSpec((2, Hp), const),
            pl.BlockSpec((1, Cp), const),
        ],
        out_specs=(pl.BlockSpec((tb, Cp), row),
                   pl.BlockSpec((None, 2, Cp), lambda i: (i, 0, 0))),
        compiler_params=pltpu.CompilerParams(
            dimension_semantics=("parallel",),
            vmem_limit_bytes=vmem_limit),
        cost_estimate=pl.CostEstimate(flops=flops1, transcendentals=0,
                                      bytes_accessed=bytes1),
    )(xb, prep["w1p"], prep["w2p"], prep["w3p"], prep["w4p"],
      prep["bh"], prep["bc"])

    # ---- tiny finalize (fused under jit): mean/var -> scale/shift ----
    stats = jnp.sum(part, axis=0)                       # (2, Cp)
    inv_n = 1.0 / B
    mean = stats[0] * inv_n
    var = jnp.maximum(stats[1] * inv_n - mean * mean, 0.0)   # biased var, clamped
    scale = prep["gamma_p"] * jax.lax.rsqrt(var + EPS)
    shift = prep["beta_p"] - mean * scale
    ss = jnp.stack([scale, shift])                      # (2, Cp)

    # ---- pass 2: batch-tiled, batch-parallel BN-apply + sigmoid ----
    out_pad = pl.pallas_call(
        bn_sigmoid_kernel,
        out_shape=jax.ShapeDtypeStruct((Bp, Cp), jnp.float32),
        grid=(nb,),
        in_specs=[pl.BlockSpec((tb, Cp), row),
                  pl.BlockSpec((2, Cp), const)],
        out_specs=pl.BlockSpec((tb, Cp), row),
        compiler_params=pltpu.CompilerParams(
            dimension_semantics=("parallel",),
            vmem_limit_bytes=vmem_limit),
        cost_estimate=pl.CostEstimate(flops=4 * Bp * Cp,
                                      transcendentals=2 * Bp * Cp,
                                      bytes_accessed=Bp * Cp * (2 + 4) + 2 * Cp * 4),
    )(y_pre, ss)

    return out_pad[:B, :C]


def init_params(key, input_size, nhidden, out_channels):
    # Deterministic synthetic init (Kaiming-uniform-ish, like nn.Linear).
    ks = jax.random.split(key, 7)

    def lin_w(k, fan_in, fan_out):
        bound = 1.0 / jnp.sqrt(fan_in)
        # stored as (in, out) == PyTorch weight (out, in) transposed
        return jax.random.uniform(k, (fan_in, fan_out), jnp.float32, -bound, bound)

    def lin_b(k, fan_in, fan_out):
        bound = 1.0 / jnp.sqrt(fan_in)
        return jax.random.uniform(k, (fan_out,), jnp.float32, -bound, bound)

    w1 = lin_w(ks[0], input_size, nhidden)          # Linear(D, H, bias=False)
    w2 = lin_w(ks[1], nhidden, nhidden)
    b2 = lin_b(ks[2], nhidden, nhidden)
    w3 = lin_w(ks[3], nhidden, nhidden)
    b3 = lin_b(ks[4], nhidden, nhidden)
    w4 = lin_w(ks[5], nhidden, out_channels)
    b4 = lin_b(ks[6], nhidden, out_channels)
    gamma = jnp.ones((out_channels,), jnp.float32)  # BatchNorm1d init
    beta = jnp.zeros((out_channels,), jnp.float32)
    return (w1, w2, b2, w3, b3, w4, b4, gamma, beta)


def reference_forward(x, params):
    # Pure-JAX reference modelling the kernel's documented precision choices:
    # bf16 MXU operands with f32 accumulation, and the bf16 storage of the
    # pre-BN activations (both intentional tradeoffs vs. PyTorch's f32 path).
    (w1, w2, b2, w3, b3, w4, b4, gamma, beta) = params

    def mm(a, w):
        return jnp.dot(a.astype(jnp.bfloat16), w.astype(jnp.bfloat16),
                       preferred_element_type=jnp.float32)

    h = jnp.maximum(mm(x, w1), 0.0)
    h = jnp.maximum(mm(h, w2) + b2, 0.0)
    h = jnp.maximum(mm(h, w3) + b3, 0.0)
    y = mm(h, w4) + b4
    mean = jnp.mean(y, axis=0, keepdims=True)
    var = jnp.mean((y - mean) ** 2, axis=0, keepdims=True)   # biased (training)
    yq = y.astype(jnp.bfloat16).astype(jnp.float32)          # bf16 y_pre storage
    z = (yq - mean) * jax.lax.rsqrt(var + EPS) * gamma + beta
    return 1.0 / (1.0 + jnp.exp(-z))


if __name__ == "__main__":
    key = jax.random.PRNGKey(0)
    k_x, k_p = jax.random.split(key)

    B, D, H, C = 8, 32, 64, 1   # batch, input_size, nhidden, out_channels
    x = jax.random.normal(k_x, (B, D), jnp.float32)
    params = init_params(k_p, D, H, C)

    prep = prepare_params(params)   # one-time weight padding / bf16 cast
    fwd = jax.jit(functools.partial(simple_mlp_forward, out_channels=C))

    out = jax.block_until_ready(fwd(x, prep))

    ref = reference_forward(x, params)
    assert out.shape == (B, C)
    max_err = float(jnp.max(jnp.abs(out - ref)))
    assert jnp.allclose(out, ref, atol=2e-3, rtol=2e-3), max_err

    # TODO(synk): BatchNorm1d running_mean/running_var buffer updates (a
    # training-side mutation, not part of the returned tensor) are not emitted.

    print("KERNEL_OK")
</pallas_src>

<mosaic_0001>
module attributes {stable_mosaic.version = 11 : i64} {
  func.func @mlp_fused_kernel(%arg0: i32, %arg1: memref<16x32xbf16, #tpu.memory_space<vmem>>, %arg2: memref<32x128xbf16, #tpu.memory_space<vmem>>, %arg3: memref<128x128xbf16, #tpu.memory_space<vmem>>, %arg4: memref<128x128xbf16, #tpu.memory_space<vmem>>, %arg5: memref<128x128xbf16, #tpu.memory_space<vmem>>, %arg6: memref<2x128xf32, #tpu.memory_space<vmem>>, %arg7: memref<1x128xf32, #tpu.memory_space<vmem>>, %arg8: memref<16x128xbf16, #tpu.memory_space<vmem>>, %arg9: memref<1x2x128xf32, #tpu.memory_space<vmem>>) attributes {dimension_semantics = [#tpu.dimension_semantics<parallel>], iteration_bounds = array<i64: 1>, scalar_prefetch = 0 : i64, scratch_operands = 0 : i64, tpu.core_type = #tpu.core_type<tc>, window_params = [{transform_indices = @transform_0, window_bounds = array<i64: 16, 32>}, {pipeline_mode = #tpu.pipeline_mode<synchronous>, transform_indices = @transform_1, window_bounds = array<i64: 32, 128>}, {pipeline_mode = #tpu.pipeline_mode<synchronous>, transform_indices = @transform_2, window_bounds = array<i64: 128, 128>}, {pipeline_mode = #tpu.pipeline_mode<synchronous>, transform_indices = @transform_3, window_bounds = array<i64: 128, 128>}, {pipeline_mode = #tpu.pipeline_mode<synchronous>, transform_indices = @transform_4, window_bounds = array<i64: 128, 128>}, {pipeline_mode = #tpu.pipeline_mode<synchronous>, transform_indices = @transform_5, window_bounds = array<i64: 2, 128>}, {pipeline_mode = #tpu.pipeline_mode<synchronous>, transform_indices = @transform_6, window_bounds = array<i64: 1, 128>}, {transform_indices = @transform_7, window_bounds = array<i64: 16, 128>}, {transform_indices = @transform_8, window_bounds = array<i64: 1, 2, 128>}]} {
    %c0 = arith.constant 0 : index
    %c0_0 = arith.constant 0 : index
    %0 = vector.load %arg1[%c0, %c0_0] : memref<16x32xbf16, #tpu.memory_space<vmem>>, vector<16x32xbf16>
    %c0_1 = arith.constant 0 : index
    %c0_2 = arith.constant 0 : index
    %1 = vector.load %arg2[%c0_1, %c0_2] : memref<32x128xbf16, #tpu.memory_space<vmem>>, vector<32x128xbf16>
    %cst = arith.constant dense<0.000000e+00> : vector<16x128xf32>
    %2 = tpu.matmul %0, %1, %cst {dimension_numbers = #tpu.dot_dimension_numbers<[1], [0], [0], [1], [0, 0, 1, 1], [], []>} : vector<16x32xbf16>, vector<32x128xbf16>, vector<16x128xf32> -> vector<16x128xf32>
    %cst_3 = arith.constant 0.000000e+00 : f32
    %3 = vector.broadcast %cst_3 : f32 to vector<16x128xf32>
    %4 = arith.maximumf %2, %3 : vector<16x128xf32>
    %5 = arith.truncf %4 : vector<16x128xf32> to vector<16x128xbf16>
    %c0_4 = arith.constant 0 : index
    %c0_5 = arith.constant 0 : index
    %6 = vector.load %arg3[%c0_4, %c0_5] : memref<128x128xbf16, #tpu.memory_space<vmem>>, vector<128x128xbf16>
    %cst_6 = arith.constant dense<0.000000e+00> : vector<16x128xf32>
    %7 = tpu.matmul %5, %6, %cst_6 {dimension_numbers = #tpu.dot_dimension_numbers<[1], [0], [0], [1], [0, 0, 1, 1], [], []>} : vector<16x128xbf16>, vector<128x128xbf16>, vector<16x128xf32> -> vector<16x128xf32>
    %c0_7 = arith.constant 0 : index
    %c0_8 = arith.constant 0 : index
    %8 = vector.load %arg6[%c0_7, %c0_8] : memref<2x128xf32, #tpu.memory_space<vmem>>, vector<1x128xf32>
    %9 = vector.broadcast %8 : vector<1x128xf32> to vector<16x128xf32>
    %10 = arith.addf %7, %9 : vector<16x128xf32>
    %cst_9 = arith.constant 0.000000e+00 : f32
    %11 = vector.broadcast %cst_9 : f32 to vector<16x128xf32>
    %12 = arith.maximumf %10, %11 : vector<16x128xf32>
    %13 = arith.truncf %12 : vector<16x128xf32> to vector<16x128xbf16>
    %c0_10 = arith.constant 0 : index
    %c0_11 = arith.constant 0 : index
    %14 = vector.load %arg4[%c0_10, %c0_11] : memref<128x128xbf16, #tpu.memory_space<vmem>>, vector<128x128xbf16>
    %cst_12 = arith.constant dense<0.000000e+00> : vector<16x128xf32>
    %15 = tpu.matmul %13, %14, %cst_12 {dimension_numbers = #tpu.dot_dimension_numbers<[1], [0], [0], [1], [0, 0, 1, 1], [], []>} : vector<16x128xbf16>, vector<128x128xbf16>, vector<16x128xf32> -> vector<16x128xf32>
    %c1 = arith.constant 1 : index
    %c0_13 = arith.constant 0 : index
    %16 = vector.load %arg6[%c1, %c0_13] : memref<2x128xf32, #tpu.memory_space<vmem>>, vector<1x128xf32>
    %17 = vector.broadcast %16 : vector<1x128xf32> to vector<16x128xf32>
    %18 = arith.addf %15, %17 : vector<16x128xf32>
    %cst_14 = arith.constant 0.000000e+00 : f32
    %19 = vector.broadcast %cst_14 : f32 to vector<16x128xf32>
    %20 = arith.maximumf %18, %19 : vector<16x128xf32>
    %21 = arith.truncf %20 : vector<16x128xf32> to vector<16x128xbf16>
    %c0_15 = arith.constant 0 : index
    %c0_16 = arith.constant 0 : index
    %22 = vector.load %arg5[%c0_15, %c0_16] : memref<128x128xbf16, #tpu.memory_space<vmem>>, vector<128x128xbf16>
    %cst_17 = arith.constant dense<0.000000e+00> : vector<16x128xf32>
    %23 = tpu.matmul %21, %22, %cst_17 {dimension_numbers = #tpu.dot_dimension_numbers<[1], [0], [0], [1], [0, 0, 1, 1], [], []>} : vector<16x128xbf16>, vector<128x128xbf16>, vector<16x128xf32> -> vector<16x128xf32>
    %c0_18 = arith.constant 0 : index
    %c0_19 = arith.constant 0 : index
    %24 = vector.load %arg7[%c0_18, %c0_19] : memref<1x128xf32, #tpu.memory_space<vmem>>, vector<1x128xf32>
    %25 = vector.broadcast %24 : vector<1x128xf32> to vector<16x128xf32>
    %26 = arith.addf %23, %25 : vector<16x128xf32>
    %c16_i32 = arith.constant 16 : i32
    %27 = arith.muli %arg0, %c16_i32 : i32
    %28 = tpu.iota {dimensions = array<i32: 0>} : vector<16x128xi32>
    %29 = vector.broadcast %27 : i32 to vector<16x128xi32>
    %30 = arith.addi %29, %28 : vector<16x128xi32>
    %c8_i32 = arith.constant 8 : i32
    %31 = vector.broadcast %c8_i32 : i32 to vector<16x128xi32>
    %32 = arith.cmpi slt, %30, %31 : vector<16x128xi32>
    %cst_20 = arith.constant 0.000000e+00 : f32
    %33 = vector.broadcast %cst_20 : f32 to vector<16x128xf32>
    %34 = arith.select %32, %26, %33 : vector<16x128xi1>, vector<16x128xf32>
    %cst_21 = arith.constant dense<0.000000e+00> : vector<128xf32>
    %35 = vector.multi_reduction <add>, %34, %cst_21 [0] : vector<16x128xf32> to vector<128xf32>
    %36 = vector.shape_cast %35 : vector<128xf32> to vector<1x128xf32>
    %c0_22 = arith.constant 0 : index
    %c0_23 = arith.constant 0 : index
    %c0_24 = arith.constant 0 : index
    %37 = vector.load %arg9[%c0_22, %c0_23, %c0_24] : memref<1x2x128xf32, #tpu.memory_space<vmem>>, vector<1x1x128xf32>
    %38 = vector.shape_cast %37 : vector<1x1x128xf32> to vector<1x128xf32>
    %39 = vector.shape_cast %36 : vector<1x128xf32> to vector<1x1x128xf32>
    tpu.vector_store %arg9[%c0_22, %c0_23, %c0_24], %39 {strides = array<i32>} : memref<1x2x128xf32, #tpu.memory_space<vmem>>, vector<1x1x128xf32>,
    %40 = arith.mulf %34, %34 : vector<16x128xf32>
    %cst_25 = arith.constant dense<0.000000e+00> : vector<128xf32>
    %41 = vector.multi_reduction <add>, %40, %cst_25 [0] : vector<16x128xf32> to vector<128xf32>
    %42 = vector.shape_cast %41 : vector<128xf32> to vector<1x128xf32>
    %c0_26 = arith.constant 0 : index
    %c1_27 = arith.constant 1 : index
    %c0_28 = arith.constant 0 : index
    %43 = vector.load %arg9[%c0_26, %c1_27, %c0_28] : memref<1x2x128xf32, #tpu.memory_space<vmem>>, vector<1x1x128xf32>
    %44 = vector.shape_cast %43 : vector<1x1x128xf32> to vector<1x128xf32>
    %45 = vector.shape_cast %42 : vector<1x128xf32> to vector<1x1x128xf32>
    tpu.vector_store %arg9[%c0_26, %c1_27, %c0_28], %45 {strides = array<i32>} : memref<1x2x128xf32, #tpu.memory_space<vmem>>, vector<1x1x128xf32>,
    %46 = arith.truncf %26 : vector<16x128xf32> to vector<16x128xbf16>
    %c0_29 = arith.constant 0 : index
    %c0_30 = arith.constant 0 : index
    %47 = vector.load %arg8[%c0_29, %c0_30] : memref<16x128xbf16, #tpu.memory_space<vmem>>, vector<16x128xbf16>
    tpu.vector_store %arg8[%c0_29, %c0_30], %46 {strides = array<i32>} : memref<16x128xbf16, #tpu.memory_space<vmem>>, vector<16x128xbf16>,
    return
  }
  func.func @transform_0(%arg0: i32) -> (i32, i32) {
    %c0_i32 = arith.constant 0 : i32
    %c0_i32_0 = arith.constant 0 : i32
    return %arg0, %c0_i32 : i32, i32
  }
  func.func @transform_1(%arg0: i32) -> (i32, i32) {
    %c0_i32 = arith.constant 0 : i32
    %c0_i32_0 = arith.constant 0 : i32
    %c0_i32_1 = arith.constant 0 : i32
    return %c0_i32, %c0_i32_0 : i32, i32
  }
  func.func @transform_2(%arg0: i32) -> (i32, i32) {
    %c0_i32 = arith.constant 0 : i32
    %c0_i32_0 = arith.constant 0 : i32
    %c0_i32_1 = arith.constant 0 : i32
    return %c0_i32, %c0_i32_0 : i32, i32
  }
  func.func @transform_3(%arg0: i32) -> (i32, i32) {
    %c0_i32 = arith.constant 0 : i32
    %c0_i32_0 = arith.constant 0 : i32
    %c0_i32_1 = arith.constant 0 : i32
    return %c0_i32, %c0_i32_0 : i32, i32
  }
  func.func @transform_4(%arg0: i32) -> (i32, i32) {
    %c0_i32 = arith.constant 0 : i32
    %c0_i32_0 = arith.constant 0 : i32
    %c0_i32_1 = arith.constant 0 : i32
    return %c0_i32, %c0_i32_0 : i32, i32
  }
  func.func @transform_5(%arg0: i32) -> (i32, i32) {
    %c0_i32 = arith.constant 0 : i32
    %c0_i32_0 = arith.constant 0 : i32
    %c0_i32_1 = arith.constant 0 : i32
    return %c0_i32, %c0_i32_0 : i32, i32
  }
  func.func @transform_6(%arg0: i32) -> (i32, i32) {
    %c0_i32 = arith.constant 0 : i32
    %c0_i32_0 = arith.constant 0 : i32
    %c0_i32_1 = arith.constant 0 : i32
    return %c0_i32, %c0_i32_0 : i32, i32
  }
  func.func @transform_7(%arg0: i32) -> (i32, i32) {
    %c0_i32 = arith.constant 0 : i32
    %c0_i32_0 = arith.constant 0 : i32
    return %arg0, %c0_i32 : i32, i32
  }
  func.func @transform_8(%arg0: i32) -> (i32, i32, i32) {
    %c0_i32 = arith.constant 0 : i32
    %c0_i32_0 = arith.constant 0 : i32
    %c0_i32_1 = arith.constant 0 : i32
    return %arg0, %c0_i32, %c0_i32_0 : i32, i32, i32
  }
}

module attributes {stable_mosaic.version = 11 : i64} {
  func.func @bn_sigmoid_kernel(%arg0: i32, %arg1: memref<16x128xbf16, #tpu.memory_space<vmem>>, %arg2: memref<2x128xf32, #tpu.memory_space<vmem>>, %arg3: memref<16x128xf32, #tpu.memory_space<vmem>>) attributes {dimension_semantics = [#tpu.dimension_semantics<parallel>], iteration_bounds = array<i64: 1>, scalar_prefetch = 0 : i64, scratch_operands = 0 : i64, tpu.core_type = #tpu.core_type<tc>, window_params = [{transform_indices = @transform_0, window_bounds = array<i64: 16, 128>}, {pipeline_mode = #tpu.pipeline_mode<synchronous>, transform_indices = @transform_1, window_bounds = array<i64: 2, 128>}, {transform_indices = @transform_2, window_bounds = array<i64: 16, 128>}]} {
    %c0 = arith.constant 0 : index
    %c0_0 = arith.constant 0 : index
    %0 = vector.load %arg1[%c0, %c0_0] : memref<16x128xbf16, #tpu.memory_space<vmem>>, vector<16x128xbf16>
    %1 = arith.extf %0 : vector<16x128xbf16> to vector<16x128xf32>
    %c0_1 = arith.constant 0 : index
    %c0_2 = arith.constant 0 : index
    %2 = vector.load %arg2[%c0_1, %c0_2] : memref<2x128xf32, #tpu.memory_space<vmem>>, vector<1x128xf32>
    %3 = vector.broadcast %2 : vector<1x128xf32> to vector<16x128xf32>
    %4 = arith.mulf %1, %3 : vector<16x128xf32>
    %c1 = arith.constant 1 : index
    %c0_3 = arith.constant 0 : index
    %5 = vector.load %arg2[%c1, %c0_3] : memref<2x128xf32, #tpu.memory_space<vmem>>, vector<1x128xf32>
    %6 = vector.broadcast %5 : vector<1x128xf32> to vector<16x128xf32>
    %7 = arith.addf %4, %6 : vector<16x128xf32>
    %cst = arith.constant 0.000000e+00 : f32
    %8 = vector.broadcast %cst : f32 to vector<16x128xf32>
    %9 = arith.subf %8, %7 : vector<16x128xf32>
    %10 = math.exp %9 : vector<16x128xf32>
    %cst_4 = arith.constant 1.000000e+00 : f32
    %11 = vector.broadcast %cst_4 : f32 to vector<16x128xf32>
    %12 = arith.addf %11, %10 : vector<16x128xf32>
    %cst_5 = arith.constant 1.000000e+00 : f32
    %13 = vector.broadcast %cst_5 : f32 to vector<16x128xf32>
    %14 = arith.divf %13, %12 : vector<16x128xf32>
    %c0_6 = arith.constant 0 : index
    %c0_7 = arith.constant 0 : index
    %15 = vector.load %arg3[%c0_6, %c0_7] : memref<16x128xf32, #tpu.memory_space<vmem>>, vector<16x128xf32>
    tpu.vector_store %arg3[%c0_6, %c0_7], %14 {strides = array<i32>} : memref<16x128xf32, #tpu.memory_space<vmem>>, vector<16x128xf32>,
    return
  }
  func.func @transform_0(%arg0: i32) -> (i32, i32) {
    %c0_i32 = arith.constant 0 : i32
    %c0_i32_0 = arith.constant 0 : i32
    return %arg0, %c0_i32 : i32, i32
  }
  func.func @transform_1(%arg0: i32) -> (i32, i32) {
    %c0_i32 = arith.constant 0 : i32
    %c0_i32_0 = arith.constant 0 : i32
    %c0_i32_1 = arith.constant 0 : i32
    return %c0_i32, %c0_i32_0 : i32, i32
  }
  func.func @transform_2(%arg0: i32) -> (i32, i32) {
    %c0_i32 = arith.constant 0 : i32
    %c0_i32_0 = arith.constant 0 : i32
    return %arg0, %c0_i32 : i32, i32
  }
}

</mosaic_0001>

<bundles_post_ra>
// kernel: simple_mlp_forward.3
= control target key start
LH: loop header
LB: loop body
LE: loop exit
PB: predicated region body
PF: predicated region fallthrough
CT: control target
= control target key end

     0   :  { %s111_s0 = inlined_call_operand.vmem [shape: bf16[16,128], index: 0, kind: input, shape index: {}]   ;;  %s112_s1 = inlined_call_operand.vmem [shape: f32[2,128], index: 1, kind: input, shape index: {}]   ;;  %s113_s2 = inlined_call_operand.vmem [shape: f32[16,128], index: 2, kind: output, shape index: {}]  }
   0x1   :  { %v68_v0 = vld [vmem:[%s111_s0] sm:$0xff]  }
   0x2   :  { %v71_v1 = vld [vmem:[%s112_s1] ss:$0 sm:$0xff]  ;;  %v69_v2 = vunpack.c.l.bf16 %v68_v0  ;;  %v72_v3 = vld [vmem:[%s112_s1 + $0x1] ss:$0 sm:$0xff]  ;;  %v70_v4 = vunpack.c.h.bf16 %v68_v0 }
   0x4   :  { %v17_v5 = vmul.f32 %v71_v1, %v69_v2  ;;  %v18_v6 = vmul.f32 %v71_v1, %v70_v4 }
   0x6   :  { %v21_v7 = vadd.f32 %v72_v3, %v17_v5  ;;  %v22_v8 = vadd.f32 %v72_v3, %v18_v6 }
   0x8   :  { %v23_v9 = vsub.f32 0.0, %v21_v7  ;;  %v24_v10 = vsub.f32 0.0, %v22_v8 }
   0xa   :  { %v25_v11 = vmul.f32 1.442695, %v23_v9  ;;  %v27_v12 = vmul.f32 1.442695, %v24_v10 }
   0xc   :  { %73 = vpow2.f32 %v25_v11 }
   0xd   :  { %75 = vpow2.f32 %v27_v12 }
  0x12   :  { %v74_v13 = vpop.eup %73 }
  0x13   :  { %v76_v14 = vpop.eup %75  ;;  %v29_v15 = vadd.f32 1.0, %v74_v13 }
  0x14   :  { %v30_v16 = vadd.f32 1.0, %v76_v14 }
  0x15   :  { %77 = vrcp.f32 %v29_v15  ;;  %vm36_vm0 = vweird.f32 %v29_v15  ;;  %v42_v20 = vand.u32 2147483648, %v29_v15  ;;  %v40_v23 = vand.u32 2147483647, %v29_v15 }
  0x16   :  { %79 = vrcp.f32 %v30_v16  ;;  %v57_v24 = vand.u32 2147483648, %v30_v16  ;;  %vm51_vm2 = vweird.f32 %v30_v16  ;;  %v55_v26 = vand.u32 2147483647, %v30_v16 }
  0x17   :  { %v43_v28 = vor.u32 1.1754944e-38, %v42_v20  ;;  %vm41_vm5 = vcmp.eq.f32.partialorder %v40_v23, 8.507059e+37 }
  0x18   :  { %v58_v31 = vor.u32 1.1754944e-38, %v57_v24  ;;  %vm56_vm7 = vcmp.eq.f32.partialorder %v55_v26, 8.507059e+37 }
  0x1b   :  { %v78_v17 = vpop.eup %77 }
  0x1c   :  { %v80_v18 = vpop.eup %79  ;;  %v32_v19 = vmul.f32 %v78_v17, %v29_v15  ;;  %vm37_vm1 = vweird.f32 %v78_v17 }
  0x1d   :  { %v47_v21 = vmul.f32 %v80_v18, %v30_v16  ;;  %vm52_vm3 = vweird.f32 %v80_v18  ;;  %vm38_vm4 = vmor %vm36_vm0, %vm37_vm1 }
  0x1e   :  { %v33_v22 = vsub.f32 1.0, %v32_v19  ;;  %vm53_vm6 = vmor %vm51_vm2, %vm52_vm3 }
  0x1f   :  { %v48_v25 = vsub.f32 1.0, %v47_v21 }
  0x20   :  { %v34_v27 = vmul.f32 %v78_v17, %v33_v22 }
  0x21   :  { %v49_v29 = vmul.f32 %v80_v18, %v48_v25 }
  0x22   :  { %v35_v30 = vadd.f32 %v78_v17, %v34_v27 }
  0x23   :  { %v50_v32 = vadd.f32 %v80_v18, %v49_v29 }
  0x24   :  { %v39_v33 = vsel %vm38_vm4, %v78_v17, %v35_v30 }
  0x25   :  { %v44_v34 = vsel %vm41_vm5, %v43_v28, %v39_v33  ;;  %v54_v35 = vsel %vm53_vm6, %v80_v18, %v50_v32 }
  0x26   :  { %61 = vst [vmem:[%s113_s2] sm:$0xff] %v44_v34  ;;  %v59_v36 = vsel %vm56_vm7, %v58_v31, %v54_v35 }
  0x27   :  { %62 = vst [vmem:[%s113_s2 + $0x8] sm:$0xff] %v59_v36 }

// kernel: simple_mlp_forward.2
= control target key start
LH: loop header
LB: loop body
LE: loop exit
PB: predicated region body
PF: predicated region fallthrough
CT: control target
= control target key end

     0   :  { %14 = vsyncpa [#allocation3], 0  ;;  %s722_s0 = inlined_call_operand.vmem [shape: bf16[16,32], index: 0, kind: input, shape index: {}]   ;;  %s723_s1 = inlined_call_operand.vmem [shape: bf16[32,128], index: 1, kind: input, shape index: {}]   ;;  %s724_s2 = inlined_call_operand.hbm [shape: bf16[128,128], index: 2, kind: input, shape index: {}]   ;;  %s725_s3 = inlined_call_operand.hbm [shape: bf16[128,128], index: 3, kind: input, shape index: {}]   ;;  %s726_s4 = inlined_call_operand.hbm [shape: bf16[128,128], index: 4, kind: input, shape index: {}]   ;;  %s727_s5 = inlined_call_operand.vmem [shape: f32[2,128], index: 5, kind: input, shape index: {}]   ;;  %s728_s6 = inlined_call_operand.vmem [shape: f32[1,128], index: 6, kind: input, shape index: {}]   ;;  %s729_s7 = inlined_call_operand.vmem [shape: bf16[16,128], index: 7, kind: output, shape index: {0}]   ;;  %s730_s8 = inlined_call_operand.vmem [shape: f32[1,2,128], index: 8, kind: output, shape index: {1}]  }
   0x1   :  { %15 = vsyncpa [#allocation5], 0  ;;  %s37_s29 = sshll.u32 %s725_s3, 4  ;;  %s636_s30 = smov [#allocation4]   ;;  %s38_s29 = int_to_ptr.hbm [resolvable:$true] %s37_s29 }
   0x2   :  { %s39_s9 = sshll.u32 %s636_s30, 4  ;;  %s24_s12 = sshll.u32 %s724_s2, 4  ;;  %s40_s9 = int_to_ptr.vmem [resolvable:$true] %s39_s9  ;;  %s25_s12 = int_to_ptr.hbm [resolvable:$true] %s24_s12 }
   0x3   :  { %s637_s13 = smov 64   ;;  %s638_s14 = smov 4  }
   0x4   :  { %45 = dma.hbm_to_vmem [thread:$0]  %s38_s29, 1024, %s40_s9, [#allocation5], %s637_s13, %s637_s13, %s638_s14  }
   0x5   :  { %s639_s15 = smov [#allocation2]   ;;  %s50_s19 = sshll.u32 %s726_s4, 4  ;;  %s51_s19 = int_to_ptr.hbm [resolvable:$true] %s50_s19 }
   0x6   :  { %s26_s16 = sshll.u32 %s639_s15, 4  ;;  %s640_s3 = smov [#allocation6]   ;;  %s27_s16 = int_to_ptr.vmem [resolvable:$true] %s26_s16 }
   0x7   :  { %32 = dma.hbm_to_vmem [thread:$0]  %s25_s12, 1024, %s27_s16, [#allocation3], %s637_s13, %s637_s13, %s638_s14  }
   0x8   :  { %s52_s20 = sshll.u32 %s640_s3, 4  ;;  %s53_s20 = int_to_ptr.vmem [resolvable:$true] %s52_s20 }
   0x9   :  { %58 = dma.hbm_to_vmem [thread:$0]  %s51_s19, 1024, %s53_s20, [#allocation5], %s637_s13, %s637_s13, %s638_s14  }
   0xa   :  { %632 = dma.done.wait [#allocation3], 1024  }
   0xb   :  { %633 = vsyncadd [#allocation3], 4294966272 }
   0xc   :  { %634 = dma.done.wait [#allocation5], 2048  }
   0xd   :  { %635 = vsyncadd [#allocation5], 4294965248  ;;  %v522_v0 = vld [vmem:[%s723_s1 + $0x8] sm:$0xff]  ;;  %v530_v1 = vld [vmem:[#allocation2 + $0x38] sm:$0xff]  ;;  %vm99_vm0 = vcmask 261120  }
   0xe   :  { %109 = vmatpush.bf16.msra.mxu0 %v522_v0  ;;  %v521_v2 = vld [vmem:[%s723_s1] sm:$0xff]  ;;  %186 = vmatpush.bf16.msra.mxu1 %v530_v1  ;;  %v529_v3 = vld [vmem:[#allocation2 + $0x30] sm:$0xff]  ;;  %v528_v5 = vld [vmem:[#allocation2 + $0x28] sm:$0xff] }
   0xf   :  { %v520_v4 = vld [vmem:[%s722_s0] sm:$0xff]  ;;  %v526_v7 = vld [vmem:[#allocation2 + $0x18] sm:$0xff]  ;;  %v525_v8 = vld [vmem:[#allocation2 + $0x10] sm:$0xff] }
  0x10   :  { %v527_v6 = vld [vmem:[#allocation2 + $0x20] sm:$0xff]  ;;  %v524_v9 = vld [vmem:[#allocation2 + $0x8] sm:$0xff]  ;;  %v538_v11 = vld [vmem:[#allocation4 + $0x38] sm:$0xff] }
  0x11   :  { %v523_v10 = vld [vmem:[#allocation2] sm:$0xff]  ;;  %269 = vmatpush.bf16.msra.mxu2 %v538_v11  ;;  %v537_v12 = vld [vmem:[#allocation4 + $0x30] sm:$0xff]  ;;  %v536_v13 = vld [vmem:[#allocation4 + $0x28] sm:$0xff] }
  0x12   :  { %110 = vmatpush.bf16.msra.mxu0 %v521_v2  ;;  %187 = vmatpush.bf16.msra.mxu1 %v529_v3  ;;  %v535_v14 = vld [vmem:[#allocation4 + $0x20] sm:$0xff]  ;;  %v534_v20 = vld [vmem:[#allocation4 + $0x18] sm:$0xff]  ;;  %v533_v21 = vld [vmem:[#allocation4 + $0x10] sm:$0xff] }
  0x13   :  { %v532_v22 = vld [vmem:[#allocation4 + $0x8] sm:$0xff]  ;;  %v531_v23 = vld [vmem:[#allocation4] sm:$0xff]  ;;  %v546_v24 = vld [vmem:[#allocation6 + $0x38] sm:$0xff] }
  0x14   :  { %354 = vmatpush.bf16.msra.mxu3 %v546_v24  ;;  %v545_v25 = vld [vmem:[#allocation6 + $0x30] sm:$0xff]  ;;  %v544_v26 = vld [vmem:[#allocation6 + $0x28] sm:$0xff]  ;;  %v543_v27 = vld [vmem:[#allocation6 + $0x20] sm:$0xff] }
  0x15   :  { %423 = vmatmul.msk.bf16.vlgmr.msra.gmra.mxu0 %vm99_vm0, %v520_v4  ;;  %270 = vmatpush.bf16.msra.mxu2 %v537_v12  ;;  %v557_v29 = vld [vmem:[%s727_s5] ss:$0 sm:$0xff]  ;;  %v542_v36 = vld [vmem:[#allocation6 + $0x18] sm:$0xff]  ;;  %v541_v37 = vld [vmem:[#allocation6 + $0x10] sm:$0xff] }
  0x16   :  { %188 = vmatpush.bf16.msra.mxu1 %v528_v5  ;;  %v540_v38 = vld [vmem:[#allocation6 + $0x8] sm:$0xff]  ;;  %v539_v39 = vld [vmem:[#allocation6] sm:$0xff] }
  0x17   :  { %v558_v41 = vld [vmem:[%s727_s5 + $0x1] ss:$0 sm:$0xff]  ;;  %v559_v48 = vld [vmem:[%s728_s6] ss:$0 sm:$0xff] }
  0x18   :  { %355 = vmatpush.bf16.msra.mxu3 %v545_v25 }
  0x19   :  { %271 = vmatpush.bf16.msra.mxu2 %v536_v13 }
  0x1a   :  { %189 = vmatpush.bf16.msra.mxu1 %v527_v6 }
  0x1c   :  { %356 = vmatpush.bf16.msra.mxu3 %v544_v26 }
  0x1d   :  { %272 = vmatpush.bf16.msra.mxu2 %v535_v14 }
  0x1e   :  { %190 = vmatpush.bf16.msra.mxu1 %v526_v7 }
  0x20   :  { %357 = vmatpush.bf16.msra.mxu3 %v543_v27 }
  0x21   :  { %273 = vmatpush.bf16.msra.mxu2 %v534_v20 }
  0x22   :  { %191 = vmatpush.bf16.msra.mxu1 %v525_v8 }
  0x24   :  { %358 = vmatpush.bf16.msra.mxu3 %v542_v36 }
  0x25   :  { %274 = vmatpush.bf16.msra.mxu2 %v533_v21 }
  0x26   :  { %192 = vmatpush.bf16.msra.mxu1 %v524_v9 }
  0x28   :  { %359 = vmatpush.bf16.msra.mxu3 %v541_v37 }
  0x29   :  { %275 = vmatpush.bf16.msra.mxu2 %v532_v22 }
  0x2a   :  { %193 = vmatpush.bf16.msra.mxu1 %v523_v10 }
  0x2c   :  { %360 = vmatpush.bf16.msra.mxu3 %v540_v38 }
  0x2d   :  { %276 = vmatpush.bf16.msra.mxu2 %v531_v23 }
  0x30   :  { %361 = vmatpush.bf16.msra.mxu3 %v539_v39 }
  0x92   :  { %v112_v15 = vpop.f32.mrf.mxu0 }
  0x93   :  { %v117_v17 = vmax.f32 %v112_v15, 0.0 }
  0x9a   :  { %v114_v16 = vpop.f32.mrf.mxu0 }
  0x9b   :  { %v118_v18 = vmax.f32 %v114_v16, 0.0 }
  0x9d   :  { %v119_v19 = vpack.c.bf16 %v118_v18, %v117_v17 }
  0x9f   :  { %194 = vmatmul.bf16.vlgmr.msra.gmra.mxu1 %v119_v19 }
 0x11c   :  { %v195_v28 = vpop.f32.mrf.mxu1 }
 0x11d   :  { %v196_v30 = vadd.f32 %v557_v29, %v195_v28 }
 0x11f   :  { %v200_v33 = vmax.f32 %v196_v30, 0.0 }
 0x124   :  { %v197_v31 = vpop.f32.mrf.mxu1 }
 0x125   :  { %v198_v32 = vadd.f32 %v557_v29, %v197_v31 }
 0x127   :  { %v201_v34 = vmax.f32 %v198_v32, 0.0 }
 0x129   :  { %v202_v35 = vpack.c.bf16 %v201_v34, %v200_v33 }
 0x12b   :  { %277 = vmatmul.bf16.vlgmr.msra.gmra.mxu2 %v202_v35 }
 0x1ae   :  { %v278_v40 = vpop.f32.mrf.mxu2 }
 0x1af   :  { %v279_v42 = vadd.f32 %v558_v41, %v278_v40 }
 0x1b1   :  { %v283_v45 = vmax.f32 %v279_v42, 0.0 }
 0x1b6   :  { %v280_v43 = vpop.f32.mrf.mxu2 }
 0x1b7   :  { %v281_v44 = vadd.f32 %v558_v41, %v280_v43 }
 0x1b9   :  { %v284_v46 = vmax.f32 %v281_v44, 0.0 }
 0x1bb   :  { %v285_v47 = vpack.c.bf16 %v284_v46, %v283_v45 }
 0x1bd   :  { %362 = vmatmul.bf16.vlgmr.msra.gmra.mxu3 %v285_v47 }
 0x240   :  { %v363_v49 = vpop.f32.mrf.mxu3 }
 0x241   :  { %v364_v50 = vadd.f32 %v559_v48, %v363_v49 }
 0x243   :  { %v380_v51 = vrot.slane %v364_v50, 4  ;;  %v387_v52 = vmul.f32 %v364_v50, %v364_v50 }
 0x245   :  { %v381_v53 = vadd.f32 %v380_v51, %v364_v50  ;;  %v390_v54 = vrot.slane %v387_v52, 4 }
 0x247   :  { %v382_v55 = vrot.slane %v381_v53, 2  ;;  %v391_v56 = vadd.f32 %v390_v54, %v387_v52 }
 0x248   :  { %v365_v57 = vpop.f32.mrf.mxu3 }
 0x249   :  { %v383_v58 = vadd.f32 %v382_v55, %v381_v53  ;;  %v392_v59 = vrot.slane %v391_v56, 2  ;;  %v366_v60 = vadd.f32 %v559_v48, %v365_v57 }
 0x24b   :  { %v384_v61 = vrot.slane %v383_v58, 1  ;;  %v393_v62 = vadd.f32 %v392_v59, %v391_v56  ;;  %v550_v63 = vpack.c.bf16 %v366_v60, %v364_v50 }
 0x24d   :  { %v385_v0 = vadd.f32 %v384_v61, %v383_v58  ;;  %v394_v1 = vrot.slane %v393_v62, 1  ;;  %551 = vst [vmem:[%s729_s7] sm:$0xff] %v550_v63  }
 0x24f   :  { %386 = vst [vmem:[%s730_s8] sm:$0x1] %v385_v0  ;;  %v395_v2 = vadd.f32 %v394_v1, %v393_v62 }
 0x251   :  { %396 = vst [vmem:[%s730_s8 + $0x1] sm:$0x1] %v395_v2 }
 0x252   :  { %409 = vsyncpa [#allocation3], 1 }
 0x253   :  { %410 = vsyncpa [#allocation5], 1 }

</bundles_post_ra>
